<compile_context>
chip_gen: v7x
topology: tpu7x:2x2x1
jax: 0.10.0
libtpu: 0.0.40
codegen_flags: <defaults>
</compile_context>

<pallas_src>
import functools

import jax
import jax.numpy as jnp
from jax.experimental import pallas as pl
from jax.experimental.pallas import tpu as pltpu


def _round_up(x, m):
    return (x + m - 1) // m * m


def _pick_block_rows(M, B, requested):
    """Sublane-dense block size along the row axis (multiple of 8, <= M)."""
    if M <= 8:
        return M                              # single block == full dim (legal layout)
    cap = (M // 8) * 8                        # largest multiple of 8 that fits in M
    br = min(max(8, _round_up(requested, 8)), cap)
    # Keep >= ~4 total grid points (2 per TensorCore on v7x) when the image allows.
    want_per_batch = max(1, pl.cdiv(4, B))
    if pl.cdiv(M, br) < want_per_batch:
        br = min(cap, max(8, _round_up(pl.cdiv(M, want_per_batch), 8)))
    return br


def _backproject_kernel(invk_ref, depth_ref, out_ref, *, width):
    # invk_ref : (B, 16) f32 in SMEM (row-major flattened 4x4 inverse intrinsics)
    # depth_ref: (1, R, 128) native-dtype in VMEM
    # out_ref  : (1, 4, R, 128) f32 in VMEM -- rows [X, Y, Z, 1]
    b = pl.program_id(0)
    t = pl.program_id(1)

    rows = depth_ref.shape[1]
    lanes = depth_ref.shape[2]
    w = float(width)

    # Global flat pixel index of every element of this block (exact int32,
    # converted once to f32; exact in f32 for images with < 2**24 pixels).
    r_idx = jax.lax.broadcasted_iota(jnp.int32, (rows, lanes), 0)
    l_idx = jax.lax.broadcasted_iota(jnp.int32, (rows, lanes), 1)
    idx_i = t * (rows * lanes) + r_idx * lanes + l_idx
    idx = idx_i.astype(jnp.float32)

    # idx = py * W + px : float recip-mul + floor, then exact +/-1 correction.
    py = jnp.floor(idx * (1.0 / w))
    px = idx - py * w
    over = px >= w
    py = jnp.where(over, py + 1.0, py)
    px = jnp.where(over, px - w, px)
    under = px < 0.0
    py = jnp.where(under, py - 1.0, py)
    px = jnp.where(under, px + w, px)

    # inv_K[:3, :3] entries as SMEM scalar loads (broadcast-multiplied on VPU).
    k00 = invk_ref[b, 0];  k01 = invk_ref[b, 1];  k02 = invk_ref[b, 2]
    k10 = invk_ref[b, 4];  k11 = invk_ref[b, 5];  k12 = invk_ref[b, 6]
    k20 = invk_ref[b, 8];  k21 = invk_ref[b, 9];  k22 = invk_ref[b, 10]

    d = depth_ref[0].astype(jnp.float32)                      # in-kernel cast
    out_ref[0, 0, :, :] = (k00 * px + k01 * py + k02) * d     # X
    out_ref[0, 1, :, :] = (k10 * px + k11 * py + k12) * d     # Y
    out_ref[0, 2, :, :] = (k20 * px + k21 * py + k22) * d     # Z
    out_ref[0, 3, :, :] = jnp.ones_like(d)                    # homogeneous 1


def backproject_depth(depth, inv_K, *, block_rows=1024):
    """depth: (B, 1, H, W) or (B, H, W); inv_K: (B, 4, 4) -> cam_points (B, 4, H*W)."""
    if depth.ndim == 4:
        B = depth.shape[0]
        H, W = depth.shape[-2], depth.shape[-1]
    else:
        B, H, W = depth.shape
    N = H * W
    if N >= (1 << 24):
        raise ValueError(
            "backproject_depth: H*W must be < 2**24 for exact f32 pixel indices")

    lanes = 128
    M = pl.cdiv(N, lanes)                      # number of 128-pixel rows
    br = _pick_block_rows(M, B, block_rows)
    n_blocks = pl.cdiv(M, br)                  # partial edge block is masked by Pallas

    depth_flat = depth.reshape(B, N)           # native dtype, bitcast reshape
    lane_pad = M * lanes - N
    if lane_pad:
        # TODO(synk): lane-ragged H*W still costs one pad (depth) + one slice (output).
        depth_flat = jnp.pad(depth_flat, ((0, 0), (0, lane_pad)))
    depth_2d = depth_flat.reshape(B, M, lanes)

    invk_flat = inv_K.reshape(B, 16).astype(jnp.float32)

    in_bytes = B * N * depth.dtype.itemsize
    out_bytes = B * 4 * M * lanes * 4
    cost = pl.CostEstimate(flops=30 * B * N, transcendentals=0,
                           bytes_accessed=in_bytes + out_bytes)

    out = pl.pallas_call(
        functools.partial(_backproject_kernel, width=W),
        out_shape=jax.ShapeDtypeStruct((B, 4, M, lanes), jnp.float32),
        grid_spec=pltpu.PrefetchScalarGridSpec(
            num_scalar_prefetch=0,
            grid=(B, n_blocks),
            in_specs=[
                pl.BlockSpec(memory_space=pltpu.MemorySpace.SMEM),        # inv_K
                pl.BlockSpec((1, br, lanes), lambda b, t: (b, t, 0)),      # depth
            ],
            out_specs=pl.BlockSpec((1, 4, br, lanes),
                                   lambda b, t: (b, 0, t, 0)),
        ),
        compiler_params=pltpu.CompilerParams(
            dimension_semantics=("parallel", "parallel"),
            vmem_limit_bytes=32 * 1024 * 1024),
        cost_estimate=cost,
    )(invk_flat, depth_2d)

    cam = out.reshape(B, 4, M * lanes)
    if lane_pad:
        cam = cam[:, :, :N]
    return cam


def backproject_depth_ref(depth, inv_K, height, width):
    """Pure-JAX reference mirroring the PyTorch forward."""
    B = depth.shape[0]
    N = height * width
    xs, ys = jnp.meshgrid(jnp.arange(width, dtype=jnp.float32),
                          jnp.arange(height, dtype=jnp.float32), indexing="xy")
    pix = jnp.stack([xs.reshape(-1), ys.reshape(-1),
                     jnp.ones((N,), jnp.float32)], axis=0)          # (3, N)
    cam = jnp.einsum("bij,jn->bin", inv_K[:, :3, :3].astype(jnp.float32), pix,
                     precision=jax.lax.Precision.HIGHEST)
    cam = depth.reshape(B, 1, N).astype(jnp.float32) * cam
    ones = jnp.ones((B, 1, N), jnp.float32)
    return jnp.concatenate([cam, ones], axis=1)


def _make_inv_K(key, B):
    base_inv_K = jnp.eye(4, dtype=jnp.float32)
    base_inv_K = base_inv_K.at[0, 0].set(1.0 / 100.0)
    base_inv_K = base_inv_K.at[1, 1].set(1.0 / 100.0)
    base_inv_K = base_inv_K.at[0, 2].set(-0.5)
    base_inv_K = base_inv_K.at[1, 2].set(-0.5)
    return (jnp.broadcast_to(base_inv_K, (B, 4, 4))
            + 0.01 * jax.random.normal(key, (B, 4, 4), jnp.float32))


if __name__ == "__main__":
    key = jax.random.PRNGKey(0)

    # Main case: B=2, H=W=16 (N multiple of 128 -> fully copy-free path).
    B, H, W = 2, 16, 16
    k_depth, k_K, key = jax.random.split(key, 3)
    depth = jax.random.uniform(k_depth, (B, 1, H, W), jnp.float32,
                               minval=0.1, maxval=10.0)
    inv_K = _make_inv_K(k_K, B)
    out = jax.block_until_ready(backproject_depth(depth, inv_K))
    ref = backproject_depth_ref(depth, inv_K, H, W)
    assert out.shape == (B, 4, H * W)
    assert jnp.allclose(out, ref, atol=1e-5, rtol=1e-5), \
        float(jnp.max(jnp.abs(out - ref)))

    # Ragged-lane case (N % 128 != 0) exercises the pad/slice fallback.
    B2, H2, W2 = 1, 9, 20
    k_depth2, k_K2, key = jax.random.split(key, 3)
    depth2 = jax.random.uniform(k_depth2, (B2, 1, H2, W2), jnp.float32,
                                minval=0.1, maxval=10.0)
    inv_K2 = _make_inv_K(k_K2, B2)
    out2 = jax.block_until_ready(backproject_depth(depth2, inv_K2))
    ref2 = backproject_depth_ref(depth2, inv_K2, H2, W2)
    assert out2.shape == (B2, 4, H2 * W2)
    assert jnp.allclose(out2, ref2, atol=1e-5, rtol=1e-5), \
        float(jnp.max(jnp.abs(out2 - ref2)))

    # bf16 depth + partial edge block (M = 11 rows, block_rows = 8): exercises
    # the in-kernel cast and Pallas edge-block masking (no M-padding).
    B3, H3, W3 = 1, 24, 56
    k_depth3, k_K3, key = jax.random.split(key, 3)
    depth3 = jax.random.uniform(k_depth3, (B3, 1, H3, W3), jnp.float32,
                                minval=0.1, maxval=10.0).astype(jnp.bfloat16)
    inv_K3 = _make_inv_K(k_K3, B3)
    out3 = jax.block_until_ready(backproject_depth(depth3, inv_K3))
    ref3 = backproject_depth_ref(depth3.astype(jnp.float32), inv_K3, H3, W3)
    assert out3.shape == (B3, 4, H3 * W3)
    assert jnp.allclose(out3, ref3, atol=1e-5, rtol=1e-5), \
        float(jnp.max(jnp.abs(out3 - ref3)))

    print("KERNEL_OK")
</pallas_src>

<mosaic_0001>
module attributes {stable_mosaic.version = 11 : i64} {
  func.func @_backproject_kernel(%arg0: i32, %arg1: i32, %arg2: memref<2x16xf32, #tpu.memory_space<smem>>, %arg3: memref<1x2x128xf32, #tpu.memory_space<vmem>>, %arg4: memref<1x4x2x128xf32, #tpu.memory_space<vmem>>) attributes {dimension_semantics = [#tpu.dimension_semantics<parallel>, #tpu.dimension_semantics<parallel>], iteration_bounds = array<i64: 2, 1>, scalar_prefetch = 0 : i64, scratch_operands = 0 : i64, tpu.core_type = #tpu.core_type<tc>, window_params = [{transform_indices = @transform_0, window_bounds = array<i64: 2, 16>}, {transform_indices = @transform_1, window_bounds = array<i64: 1, 2, 128>}, {transform_indices = @transform_2, window_bounds = array<i64: 1, 4, 2, 128>}]} {
    %0 = tpu.iota {dimensions = array<i32: 0>} : vector<2x128xi32>
    %1 = tpu.iota {dimensions = array<i32: 1>} : vector<2x128xi32>
    %c256_i32 = arith.constant 256 : i32
    %2 = arith.muli %arg1, %c256_i32 : i32
    %c128_i32 = arith.constant 128 : i32
    %3 = vector.broadcast %c128_i32 : i32 to vector<2x128xi32>
    %4 = arith.muli %0, %3 : vector<2x128xi32>
    %5 = vector.broadcast %2 : i32 to vector<2x128xi32>
    %6 = arith.addi %5, %4 : vector<2x128xi32>
    %7 = arith.addi %6, %1 : vector<2x128xi32>
    %8 = arith.sitofp %7 : vector<2x128xi32> to vector<2x128xf32>
    %cst = arith.constant 6.250000e-02 : f32
    %9 = vector.broadcast %cst : f32 to vector<2x128xf32>
    %10 = arith.mulf %8, %9 : vector<2x128xf32>
    %11 = math.floor %10 : vector<2x128xf32>
    %cst_0 = arith.constant 1.600000e+01 : f32
    %12 = vector.broadcast %cst_0 : f32 to vector<2x128xf32>
    %13 = arith.mulf %11, %12 : vector<2x128xf32>
    %14 = arith.subf %8, %13 : vector<2x128xf32>
    %cst_1 = arith.constant 1.600000e+01 : f32
    %15 = vector.broadcast %cst_1 : f32 to vector<2x128xf32>
    %16 = arith.cmpf oge, %14, %15 : vector<2x128xf32>
    %cst_2 = arith.constant 1.000000e+00 : f32
    %17 = vector.broadcast %cst_2 : f32 to vector<2x128xf32>
    %18 = arith.addf %11, %17 : vector<2x128xf32>
    %19 = arith.select %16, %18, %11 : vector<2x128xi1>, vector<2x128xf32>
    %cst_3 = arith.constant 1.600000e+01 : f32
    %20 = vector.broadcast %cst_3 : f32 to vector<2x128xf32>
    %21 = arith.subf %14, %20 : vector<2x128xf32>
    %22 = arith.select %16, %21, %14 : vector<2x128xi1>, vector<2x128xf32>
    %cst_4 = arith.constant 0.000000e+00 : f32
    %23 = vector.broadcast %cst_4 : f32 to vector<2x128xf32>
    %24 = arith.cmpf olt, %22, %23 : vector<2x128xf32>
    %cst_5 = arith.constant 1.000000e+00 : f32
    %25 = vector.broadcast %cst_5 : f32 to vector<2x128xf32>
    %26 = arith.subf %19, %25 : vector<2x128xf32>
    %27 = arith.select %24, %26, %19 : vector<2x128xi1>, vector<2x128xf32>
    %cst_6 = arith.constant 1.600000e+01 : f32
    %28 = vector.broadcast %cst_6 : f32 to vector<2x128xf32>
    %29 = arith.addf %22, %28 : vector<2x128xf32>
    %30 = arith.select %24, %29, %22 : vector<2x128xi1>, vector<2x128xf32>
    %31 = arith.index_cast %arg0 : i32 to index
    %c0 = arith.constant 0 : index
    %32 = memref.load %arg2[%31, %c0] : memref<2x16xf32, #tpu.memory_space<smem>>
    %33 = arith.index_cast %arg0 : i32 to index
    %c1 = arith.constant 1 : index
    %34 = memref.load %arg2[%33, %c1] : memref<2x16xf32, #tpu.memory_space<smem>>
    %35 = arith.index_cast %arg0 : i32 to index
    %c2 = arith.constant 2 : index
    %36 = memref.load %arg2[%35, %c2] : memref<2x16xf32, #tpu.memory_space<smem>>
    %37 = arith.index_cast %arg0 : i32 to index
    %c4 = arith.constant 4 : index
    %38 = memref.load %arg2[%37, %c4] : memref<2x16xf32, #tpu.memory_space<smem>>
    %39 = arith.index_cast %arg0 : i32 to index
    %c5 = arith.constant 5 : index
    %40 = memref.load %arg2[%39, %c5] : memref<2x16xf32, #tpu.memory_space<smem>>
    %41 = arith.index_cast %arg0 : i32 to index
    %c6 = arith.constant 6 : index
    %42 = memref.load %arg2[%41, %c6] : memref<2x16xf32, #tpu.memory_space<smem>>
    %43 = arith.index_cast %arg0 : i32 to index
    %c8 = arith.constant 8 : index
    %44 = memref.load %arg2[%43, %c8] : memref<2x16xf32, #tpu.memory_space<smem>>
    %45 = arith.index_cast %arg0 : i32 to index
    %c9 = arith.constant 9 : index
    %46 = memref.load %arg2[%45, %c9] : memref<2x16xf32, #tpu.memory_space<smem>>
    %47 = arith.index_cast %arg0 : i32 to index
    %c10 = arith.constant 10 : index
    %48 = memref.load %arg2[%47, %c10] : memref<2x16xf32, #tpu.memory_space<smem>>
    %c0_7 = arith.constant 0 : index
    %c0_8 = arith.constant 0 : index
    %c0_9 = arith.constant 0 : index
    %49 = vector.load %arg3[%c0_7, %c0_8, %c0_9] : memref<1x2x128xf32, #tpu.memory_space<vmem>>, vector<1x2x128xf32>
    %50 = vector.shape_cast %49 : vector<1x2x128xf32> to vector<2x128xf32>
    %51 = vector.broadcast %32 : f32 to vector<2x128xf32>
    %52 = arith.mulf %51, %30 : vector<2x128xf32>
    %53 = vector.broadcast %34 : f32 to vector<2x128xf32>
    %54 = arith.mulf %53, %27 : vector<2x128xf32>
    %55 = arith.addf %52, %54 : vector<2x128xf32>
    %56 = vector.broadcast %36 : f32 to vector<2x128xf32>
    %57 = arith.addf %55, %56 : vector<2x128xf32>
    %58 = arith.mulf %57, %50 : vector<2x128xf32>
    %c0_10 = arith.constant 0 : index
    %c0_11 = arith.constant 0 : index
    %c0_12 = arith.constant 0 : index
    %c0_13 = arith.constant 0 : index
    %59 = vector.load %arg4[%c0_10, %c0_11, %c0_12, %c0_13] : memref<1x4x2x128xf32, #tpu.memory_space<vmem>>, vector<1x1x2x128xf32>
    %60 = vector.shape_cast %59 : vector<1x1x2x128xf32> to vector<2x128xf32>
    %61 = vector.shape_cast %58 : vector<2x128xf32> to vector<1x1x2x128xf32>
    tpu.vector_store %arg4[%c0_10, %c0_11, %c0_12, %c0_13], %61 {strides = array<i32>} : memref<1x4x2x128xf32, #tpu.memory_space<vmem>>, vector<1x1x2x128xf32>,
    %62 = vector.broadcast %38 : f32 to vector<2x128xf32>
    %63 = arith.mulf %62, %30 : vector<2x128xf32>
    %64 = vector.broadcast %40 : f32 to vector<2x128xf32>
    %65 = arith.mulf %64, %27 : vector<2x128xf32>
    %66 = arith.addf %63, %65 : vector<2x128xf32>
    %67 = vector.broadcast %42 : f32 to vector<2x128xf32>
    %68 = arith.addf %66, %67 : vector<2x128xf32>
    %69 = arith.mulf %68, %50 : vector<2x128xf32>
    %c0_14 = arith.constant 0 : index
    %c1_15 = arith.constant 1 : index
    %c0_16 = arith.constant 0 : index
    %c0_17 = arith.constant 0 : index
    %70 = vector.load %arg4[%c0_14, %c1_15, %c0_16, %c0_17] : memref<1x4x2x128xf32, #tpu.memory_space<vmem>>, vector<1x1x2x128xf32>
    %71 = vector.shape_cast %70 : vector<1x1x2x128xf32> to vector<2x128xf32>
    %72 = vector.shape_cast %69 : vector<2x128xf32> to vector<1x1x2x128xf32>
    tpu.vector_store %arg4[%c0_14, %c1_15, %c0_16, %c0_17], %72 {strides = array<i32>} : memref<1x4x2x128xf32, #tpu.memory_space<vmem>>, vector<1x1x2x128xf32>,
    %73 = vector.broadcast %44 : f32 to vector<2x128xf32>
    %74 = arith.mulf %73, %30 : vector<2x128xf32>
    %75 = vector.broadcast %46 : f32 to vector<2x128xf32>
    %76 = arith.mulf %75, %27 : vector<2x128xf32>
    %77 = arith.addf %74, %76 : vector<2x128xf32>
    %78 = vector.broadcast %48 : f32 to vector<2x128xf32>
    %79 = arith.addf %77, %78 : vector<2x128xf32>
    %80 = arith.mulf %79, %50 : vector<2x128xf32>
    %c0_18 = arith.constant 0 : index
    %c2_19 = arith.constant 2 : index
    %c0_20 = arith.constant 0 : index
    %c0_21 = arith.constant 0 : index
    %81 = vector.load %arg4[%c0_18, %c2_19, %c0_20, %c0_21] : memref<1x4x2x128xf32, #tpu.memory_space<vmem>>, vector<1x1x2x128xf32>
    %82 = vector.shape_cast %81 : vector<1x1x2x128xf32> to vector<2x128xf32>
    %83 = vector.shape_cast %80 : vector<2x128xf32> to vector<1x1x2x128xf32>
    tpu.vector_store %arg4[%c0_18, %c2_19, %c0_20, %c0_21], %83 {strides = array<i32>} : memref<1x4x2x128xf32, #tpu.memory_space<vmem>>, vector<1x1x2x128xf32>,
    %cst_22 = arith.constant 1.000000e+00 : f32
    %84 = vector.broadcast %cst_22 : f32 to vector<2x128xf32>
    %c0_23 = arith.constant 0 : index
    %c3 = arith.constant 3 : index
    %c0_24 = arith.constant 0 : index
    %c0_25 = arith.constant 0 : index
    %85 = vector.load %arg4[%c0_23, %c3, %c0_24, %c0_25] : memref<1x4x2x128xf32, #tpu.memory_space<vmem>>, vector<1x1x2x128xf32>
    %86 = vector.shape_cast %85 : vector<1x1x2x128xf32> to vector<2x128xf32>
    %87 = vector.shape_cast %84 : vector<2x128xf32> to vector<1x1x2x128xf32>
    tpu.vector_store %arg4[%c0_23, %c3, %c0_24, %c0_25], %87 {strides = array<i32>} : memref<1x4x2x128xf32, #tpu.memory_space<vmem>>, vector<1x1x2x128xf32>,
    return
  }
  func.func @transform_0(%arg0: i32, %arg1: i32) -> (i32, i32) {
    %c0_i32 = arith.constant 0 : i32
    %c0_i32_0 = arith.constant 0 : i32
    %c0_i32_1 = arith.constant 0 : i32
    return %c0_i32, %c0_i32_0 : i32, i32
  }
  func.func @transform_1(%arg0: i32, %arg1: i32) -> (i32, i32, i32) {
    %c0_i32 = arith.constant 0 : i32
    %c0_i32_0 = arith.constant 0 : i32
    return %arg0, %arg1, %c0_i32 : i32, i32, i32
  }
  func.func @transform_2(%arg0: i32, %arg1: i32) -> (i32, i32, i32, i32) {
    %c0_i32 = arith.constant 0 : i32
    %c0_i32_0 = arith.constant 0 : i32
    %c0_i32_1 = arith.constant 0 : i32
    return %arg0, %c0_i32, %arg1, %c0_i32_0 : i32, i32, i32, i32
  }
}

</mosaic_0001>

<bundles_post_ra>
// kernel: tpu_custom_call.1
= control target key start
LH: loop header
LB: loop body
LE: loop exit
PB: predicated region body
PF: predicated region fallthrough
CT: control target
= control target key end

     0   :  { %s887_s0 = inlined_call_operand.hbm [shape: f32[2,16], index: 0, kind: input, shape index: {}]   ;;  %s888_s1 = inlined_call_operand.hbm [shape: f32[2,2,128], index: 1, kind: input, shape index: {}]   ;;  %s889_s2 = inlined_call_operand.hbm [shape: f32[2,4,2,128], index: 2, kind: output, shape index: {}]  }
   0x1   :  { %894 = sst [smem:[#allocation11_spill]] %s887_s0 }
   0x2   :  { %895 = sst [smem:[#allocation12_spill]] %s888_s1 }
   0x3   :  { %7 = vsyncpa [#allocation5], 0 }
   0x4   :  { %8 = vsyncpa [#allocation3], 0 }
   0x5   :  { %10 = vsyncpa [#allocation3 + $0x1], 0 }
   0x6   :  { %11 = vsyncpa [#allocation4], 0 }
   0x7   :  { %13 = vsyncpa [#allocation4 + $0x1], 0  ;;  %s624_s9 = smov 0   ;;  %s626_s10 = smov 0  }
   0x8   :  { %s628_s11 = smov 0   ;;  %s630_s12 = smov 0  }
   0x9   :  { %s632_s13 = smov 0   ;;  %s634_s14 = smov 0  }
   0xa LB: > { %s373_s15 = sadd.s32 4294967295, %s601_s14   ;;  %s374_s16 = sadd.s32 4294967294, %s601_s14   ;;  %s601_s14 = sphi %s634_s14, %s19_s14   ;;  %s597_s13 = sphi %s632_s13, %s917_s13   ;;  %s593_s12 = sphi %s630_s12, %s916_s12   ;;  %s589_s11 = sphi %s628_s11, %s915_s11   ;;  %s585_s10 = sphi %s626_s10, %s914_s10   ;;  %s581_s9 = sphi %s624_s9, %s913_s9  }
   0xb   : > { %p74_p0 = scmp.ne.s32.totalorder %s585_s10, %s581_s9  ;;  %p658_p1 = scmp.eq.s32.totalorder %s373_s15, 0 }
   0xc   : > { %p662_p2 = scmp.eq.s32.totalorder %s373_s15, 1  ;;  %p106_p3 = scmp.eq.s32.totalorder %s374_s16, 1 }
   0xd   : > { %s896_s17 = scalar_select %p658_p1, 1, 0 }
   0xe   : > { %p668_p4 = por %p658_p1, %p74_p0  ;;  %p375_p5 = scmp.ge.s32.totalorder %s601_s14, 1 }
   0xf   : > { %p673_p6 = por %p106_p3, %p74_p0  ;;  %p113_p7 = scmp.lt.s32.totalorder %s601_s14, 3 }
  0x10   : > { %s898_s19 = scalar_select %p668_p4, 1, 0 }
  0x11   : > { %s899_s20 = scalar_select %p673_p6, 1, 0 }
  0x12   : > { %p678_p8 = pnand %p375_p5, %p113_p7  ;;  %s31_s22 = sadd.s32 1, %s597_s13 }
  0x13   : > { %p692_p12 = scmp.ge.s32.totalorder %s31_s22, 2  ;;  %s61_s25 = sadd.s32 1, %s589_s11 }
  0x14   : > { %p404_p10 = pneg %p678_p8  ;;  %p68_p13 = scmp.ne.s32.totalorder %s589_s11, %s585_s10 }
  0x15   : > { %p69_p0 = scmp.eq.s32.totalorder %s601_s14, 0  ;;  %s903_s0 = sld [smem:[#allocation11_spill]] }
  0x16   : > { %p688_p11 = pnand %p404_p10, %p658_p1 }
  0x18   : > { %p474_p5 = pneg %p688_p11 }
  0x1b   : > { %s472_s28 = scalar_lea.hbm %s903_s0, 32 }
  0x1c   : > { %p473_p3 = scmp.ne.s32.totalorder %s903_s0, %s472_s28  ;;  %p479_p9 = scmp.lt.u32.totalorder %s472_s28, %s903_s0 }
  0x1e   : > { %p475_p7 = pnand %p474_p5, %p473_p3 }
  0x20   : > { %p476_p10 = pneg %p475_p7 }
  0x22   : > { %p481_p6 = pnand %p479_p9, %p476_p10 }
  0x24   : > { %484 = shalt.err (!%p481_p6)
}
  0x25   : > { %s603_s5 = smov [#allocation2]   ;;  %s919_s22 = smov (%p692_p12, %s31_s22), 0 }
  0x26   : > { %407 = dma.hbm_to_smem (!%p688_p11), %s903_s0, 32, %s603_s5, [#allocation5]  }
  0x27   : > { %p723_p6 = por %p69_p0, %p68_p13  ;;  %p732_p9 = por %p662_p2, %p68_p13 }
  0x28   : > { %s56_s16 = ssub.s32 %s597_s13, %s919_s22  ;;  %p417_p3 = scmp.lt.s32.totalorder %s601_s14, 2 }
  0x29   : > { %s905_s15 = scalar_select %p732_p9, 1, 0 }
  0x2a   : > { %p59_p5 = scmp.eq.s32.totalorder %s56_s16, 0  ;;  %s135_s23 = sand.u32 1, %s589_s11  }
  0x2b   : > { %s378_s24 = sshll.u32 %s135_s23, 1  ;;  %s379_s27 = sshll.u32 %s597_s13, 5 }
  0x2c   : > { %s741_s26 = scalar_select %p59_p5, %s589_s11, %s61_s25  }
  0x2d   : > { %s906_s1 = sld [smem:[#allocation12_spill]]  ;;  %s139_s18 = scalar_lea.vmem [#allocation6], %s378_s24 }
  0x2e   : > { %s147_s3 = sshll.u32 %s139_s18, 4  ;;  %p753_p2 = pnand %p417_p3, %p723_p6  ;;  %s749_s3 = int_to_ptr.vmem [resolvable:$true] %s147_s3 }
  0x2f   : > { %s136_s25 = scalar_lea.sflag [#allocation3], %s135_s23 }
  0x30   : > { %p487_p12 = pneg %p753_p2 }
  0x33   : > { %s747_s30 = scalar_lea.hbm %s906_s1, %s379_s27  ;;  %s490_s16 = scalar_lea.hbm %s906_s1, 64 }
  0x34   : > { %s485_s5 = scalar_lea.hbm %s747_s30, 32  ;;  %p491_p7 = scmp.lt.u32.totalorder %s747_s30, %s906_s1 }
  0x35   : > { %p486_p11 = scmp.ne.s32.totalorder %s747_s30, %s485_s5  ;;  %p492_p10 = scmp.lt.u32.totalorder %s490_s16, %s485_s5 }
  0x36   : > { %p494_p3 = scmp.lt.u32.totalorder %s485_s5, %s747_s30 }
  0x37   : > { %p488_p13 = pnand %p487_p12, %p486_p11  ;;  %p493_p6 = por %p492_p10, %p491_p7 }
  0x39   : > { %p489_p0 = pneg %p488_p13  ;;  %p495_p5 = por %p494_p3, %p493_p6 }
  0x3b   : > { %p496_p9 = pnand %p495_p5, %p489_p0 }
  0x3d   : > { %499 = shalt.err (!%p496_p9)
}
  0x3e   : > { %s500_s23 = scalar_lea.vmem %s749_s3, 32  ;;  %s604_s27 = smov [#allocation6]  }
  0x3f   : > { %p501_p11 = scmp.ne.s32.totalorder %s749_s3, %s500_s23  ;;  %s505_s28 = sshll.u32 %s604_s27, 4  ;;  %s506_s28 = int_to_ptr.vmem [resolvable:$false] %s505_s28 }
  0x40   : > { %s507_s29 = scalar_lea.vmem %s506_s28, 64  ;;  %p508_p1 = scmp.lt.s32.totalorder %s749_s3, %s506_s28 }
  0x41   : > { %p503_p13 = pnand %p501_p11, %p487_p12  ;;  %p509_p7 = scmp.lt.s32.totalorder %s507_s29, %s500_s23 }
  0x43   : > { %p504_p4 = pneg %p503_p13  ;;  %p510_p10 = por %p509_p7, %p508_p1 }
  0x45   : > { %p511_p6 = pnand %p510_p10, %p504_p4 }
  0x47   : > { %514 = shalt.err (!%p511_p6)
}
  0x48   : > { %411 = dma.hbm_to_vmem [thread:$0]  (!%p753_p2), %s747_s30, 32, %s749_s3, %s136_s25  }
  0x49   : > { %156 = sbr.rel (%p678_p8) target bundleno = 135 (0x87), region = 28  ;;  %p908_p9 = scmp.ne.s32.totalorder (!%p678_p8), %s896_s17, 0 }
  0x50   : > { %568 = dma.done.wait (%p908_p9), [#allocation5], 32  }
  0x51   : > { %570 = vsyncadd (%p908_p9), [#allocation5], 4294967264  ;;  %s789_s18 = sand.u32 1, %s585_s10   ;;  %p909_p1 = scmp.ne.s32.totalorder %s898_s19, 0 }
  0x52   : > { %s382_s5 = sshll.u32 %s789_s18, 1  ;;  %s163_s4 = scalar_lea.sflag [#allocation3], %s789_s18 }
  0x53   : > { %s793_s6 = scalar_lea.vmem [#allocation6], %s382_s5 }
  0x54   : > { %572 = dma.done.wait (%p909_p1), %s163_s4, 32  }
  0x55   : > { %574 = vsyncadd (%p909_p1), %s163_s4, 4294967264 }
  0x56   : > { %171 = sfence }
  0x57   : > { %s383_s17 = sshll.u32 %s789_s18, 3  ;;  %v188_v0 = vlaneseq  ;;  %v605_v3 = vmov 1.0   ;;  %s804_s30 = sshll.u32 %s593_s12, 7  ;;  %v230_v37 = vld [vmem:[%s793_s6] sm:$0x3] }
  0x58   : > { %s800_s21 = scalar_lea.vmem [#allocation7], %s383_s17  ;;  %s807_s19 = sld [smem:[#allocation2 + %s804_s30]] }
  0x59   : > { %v189_v1 = vshrl.u32 %v188_v0, 7  ;;  %v191_v2 = vand.u32 127, %v188_v0  ;;  %389 = vst [vmem:[%s800_s21 + $0x6] sm:$0x3] %v605_v3  ;;  %s214_s3 = sadd.s32 1, %s804_s30  ;;  %s220_s25 = sadd.s32 5, %s804_s30 }
  0x5a   : > { %s226_s7 = sadd.s32 9, %s804_s30  ;;  %s218_s16 = sadd.s32 4, %s804_s30 }
  0x5b   : > { %v193_v4 = vmul.u32 128, %v189_v1  ;;  %s224_s12 = sadd.s32 8, %s804_s30  ;;  %s215_s8 = sld [smem:[#allocation2 + %s214_s3]] }
  0x5c   : > { %s216_s24 = sadd.s32 2, %s804_s30  ;;  %s221_s23 = sld [smem:[#allocation2 + %s220_s25]] }
  0x5d   : > { %v196_v5 = vadd.s32 %v193_v4, %v191_v2  ;;  %s227_s27 = sld [smem:[#allocation2 + %s226_s7]]  ;;  %s222_s5 = sadd.s32 6, %s804_s30 }
  0x5e   : > { %s219_s28 = sld [smem:[#allocation2 + %s218_s16]]  ;;  %s228_s4 = sadd.s32 10, %s804_s30  ;;  %v231_v14 = vstv %s807_s19 }
  0x5f   : > { %v197_v6 = vcvt.s32.f32 %v196_v5  ;;  %s225_s29 = sld [smem:[#allocation2 + %s224_s12]]  ;;  %s277_s19 = sshll.u32 %s800_s21, 4  ;;  %s829_s19 = int_to_ptr.vmem [resolvable:$true] %s277_s19 }
  0x60   : > { %s817_s17 = sld [smem:[#allocation2 + %s216_s24]]  ;;  %s835_s7 = scalar_lea.hbm %s889_s2, %s804_s30 }
  0x61   : > { %v198_v7 = vmul.f32 0.0625, %v197_v6  ;;  %s819_s0 = sld [smem:[#allocation2 + %s222_s5]]  ;;  %v233_v15 = vstv %s215_s8  ;;  %p910_p8 = scmp.ne.s32.totalorder %s905_s15, 0 }
  0x62   : > { %s821_s1 = sld [smem:[#allocation2 + %s228_s4]]  ;;  %v242_v18 = vstv %s221_s23  ;;  %s606_s6 = smov [#allocation7]  }
  0x63   : > { %v199_v8 = vfloor.f32 %v198_v7  ;;  %v252_v19 = vstv %s227_s27  ;;  %s519_s16 = sshll.u32 %s606_s6, 4  ;;  %s520_s16 = int_to_ptr.vmem [resolvable:$false] %s519_s16 }
  0x64   : > { %v240_v21 = vstv %s219_s28  ;;  %s521_s12 = scalar_lea.vmem %s520_s16, 256  ;;  %p522_p0 = scmp.lt.s32.totalorder %s829_s19, %s520_s16 }
  0x65   : > { %v200_v9 = vmul.f32 16.0, %v199_v8  ;;  %v203_v10 = vadd.f32 1.0, %v199_v8  ;;  %v250_v22 = vstv %s225_s29 }
  0x66   : > { %v236_v31 = vstv %s817_s17 }
  0x67   : > { %v201_v11 = vsub.f32 %v197_v6, %v200_v9  ;;  %v245_v32 = vstv %s819_s0  ;;  %s263_s0 = scalar_lea.sflag [#allocation4], %s789_s18 }
  0x68   : > { %v255_v33 = vstv %s821_s1  ;;  %s515_s1 = scalar_lea.vmem %s829_s19, 128 }
  0x69   : > { %vm202_vm0 = vcmp.ge.f32.partialorder %v201_v11, 16.0  ;;  %v384_v12 = vadd.f32 -16.0, %v201_v11  ;;  %p516_p4 = scmp.ne.s32.totalorder %s829_s19, %s515_s1  ;;  %p523_p3 = scmp.lt.s32.totalorder %s521_s12, %s515_s1 }
  0x6a   : > { %v204_v13 = vsel %vm202_vm0, %v203_v10, %v199_v8 }
  0x6b   : > { %v206_v16 = vsel %vm202_vm0, %v384_v12, %v201_v11  ;;  %v385_v17 = vadd.f32 -1.0, %v204_v13  ;;  %p517_p2 = pnand %p516_p4, %p910_p8  ;;  %p524_p5 = por %p523_p3, %p522_p0 }
  0x6c   : > { %vm207_vm1 = vcmp.lt.f32.partialorder %v206_v16, 0.0  ;;  %v210_v20 = vadd.f32 16.0, %v206_v16 }
  0x6d   : > { %v209_v23 = vsel %vm207_vm1, %v385_v17, %v204_v13  ;;  %p518_p12 = pneg %p517_p2 }
  0x6e   : > { %v211_v24 = vsel %vm207_vm1, %v210_v20, %v206_v16  ;;  %v234_v25 = vmul.f32 %v233_v15, %v209_v23  ;;  %v243_v26 = vmul.f32 %v242_v18, %v209_v23  ;;  %v253_v27 = vmul.f32 %v252_v19, %v209_v23 }
  0x6f   : > { %v232_v28 = vmul.f32 %v231_v14, %v211_v24  ;;  %v241_v29 = vmul.f32 %v240_v21, %v211_v24  ;;  %v251_v30 = vmul.f32 %v250_v22, %v211_v24  ;;  %p525_p11 = pnand %p524_p5, %p518_p12 }
  0x71   : > { %v235_v34 = vadd.f32 %v234_v25, %v232_v28  ;;  %v244_v35 = vadd.f32 %v243_v26, %v241_v29  ;;  %v254_v36 = vadd.f32 %v253_v27, %v251_v30 }
  0x73   : > { %v237_v38 = vadd.f32 %v236_v31, %v235_v34  ;;  %v246_v39 = vadd.f32 %v245_v32, %v244_v35  ;;  %v256_v40 = vadd.f32 %v255_v33, %v254_v36 }
  0x75   : > { %v238_v41 = vmul.f32 %v237_v38, %v230_v37  ;;  %v247_v42 = vmul.f32 %v246_v39, %v230_v37  ;;  %v257_v43 = vmul.f32 %v256_v40, %v230_v37 }
  0x77   : > { %239 = vst [vmem:[%s800_s21] sm:$0x3] %v238_v41  ;;  %387 = vst [vmem:[%s800_s21 + $0x2] sm:$0x3] %v247_v42 }
  0x78   : > { %388 = vst [vmem:[%s800_s21 + $0x4] sm:$0x3] %v257_v43 }
  0x79   : > { %528 = shalt.err (!%p525_p11)
}
  0x7a   : > { %s529_s21 = scalar_lea.hbm %s835_s7, 128  ;;  %s533_s24 = scalar_lea.hbm %s889_s2, 256 }
  0x7b   : > { %p530_p13 = scmp.ne.s32.totalorder %s835_s7, %s529_s21  ;;  %p534_p6 = scmp.lt.u32.totalorder %s835_s7, %s889_s2 }
  0x7c   : > { %p535_p9 = scmp.lt.u32.totalorder %s533_s24, %s529_s21  ;;  %p537_p4 = scmp.lt.u32.totalorder %s529_s21, %s835_s7 }
  0x7d   : > { %p531_p7 = pnand %p530_p13, %p910_p8 }
  0x7e   : > { %p536_p1 = por %p535_p9, %p534_p6 }
  0x7f   : > { %p532_p10 = pneg %p531_p7 }
  0x80   : > { %p538_p2 = por %p537_p4, %p536_p1 }
  0x82   : > { %p539_p12 = pnand %p538_p2, %p532_p10 }
  0x84   : > { %542 = shalt.err (!%p539_p12)
}
  0x85   : > { %s607_s28 = smov 32   ;;  %s608_s29 = smov 2  }
  0x86   : > { %402 = dma.vmem_to_hbm [thread:$0]  (%p910_p8), %s829_s19, 128, %s835_s7, %s263_s0, %s607_s28, %s607_s28, %s608_s29  }
  0x87 PF: > { %s292_s5 = sand.u32 1, %s581_s9   ;;  %p911_p0 = scmp.ne.s32.totalorder %s899_s20, 0 }
  0x88   : > { %p912_p3 = scmp.ge.s32.totalorder %s601_s14, 2  ;;  %s293_s4 = scalar_lea.sflag [#allocation4], %s292_s5 }
  0x8a   : > { %p413_p5 = pnand %p912_p3, %p911_p0 }
  0x8c   : > { %576 = dma.done.wait (!%p413_p5), %s293_s4, 128  }
  0x8d   : > { %578 = vsyncadd (!%p413_p5), %s293_s4, 4294967168  ;;  %s19_s14 = sadd.s32 1, %s601_s14   ;;  %s913_s9 = smov %s585_s10 }
  0x8e   : > { %p16_p11 = scmp.ge.s32.totalorder %s19_s14, 4   ;;  %s914_s10 = smov %s589_s11 }
  0x8f   : > { %s915_s11 = smov %s741_s26  ;;  %s916_s12 = smov %s597_s13 }
  0x90   : > { %s917_s13 = smov %s919_s22  ;;  %18 = sbr.rel (!%p16_p11) target bundleno = 10 (0xa), region = 81 }
  0x97   :  { %298 = vsyncpa [#allocation3], 1 }
  0x98   :  { %300 = vsyncpa [#allocation3 + $0x1], 1 }
  0x99   :  { %301 = vsyncpa [#allocation4], 1 }
  0x9a   :  { %303 = vsyncpa [#allocation4 + $0x1], 1 }
  0x9b   :  { %304 = vsyncpa [#allocation5], 1 }
  0x9c   :  { %306 = vsyncpa [#allocation5 + $0x1], 1 }

</bundles_post_ra>
